<compile_context>
chip_gen: v5e
topology: v5e:2x2
jax: 0.10.0
libtpu: 0.0.40
codegen_flags: <defaults>
</compile_context>

<pallas_src>
import functools

import jax
import jax.numpy as jnp
from jax.experimental import pallas as pl
from jax.experimental.pallas import tpu as pltpu


def _uniform_loss_kernel(lbl_row_ref, lbl_col_ref, cnt_ref, a_ref, b_ref,
                         score_ref, rowloss_ref,
                         l_ref, s_ref, *, tn, last_tile_valid, b_resident):
    # lbl_row_ref: (TM, 1) i32    lbl_col_ref: (1, TN) i32   cnt_ref: (TM, 1) f32
    # a_ref: (TM, D)              b_ref: (TN, D) or (b_pad, D) if resident
    # score_ref: (TM, TN)         rowloss_ref: (TM, 1) f32
    # scratch l/s: (TM, 1) f32  -- running sum(exp(cos)) / masked cos sum
    j = pl.program_id(1)
    nj = pl.num_programs(1)

    @pl.when(j == 0)
    def _init():
        l_ref[...] = jnp.zeros_like(l_ref)
        s_ref[...] = jnp.zeros_like(s_ref)

    a = a_ref[...]
    if b_resident:
        # feature_b is fully VMEM-resident; slice the column block in-kernel.
        start = pl.multiple_of(j * tn, tn)
        b = b_ref[pl.ds(start, tn), :]
    else:
        b = b_ref[...]

    # Rows were normalized in the wrapper -> the dot IS the cosine score.
    # Contract the last (lane) dims directly; no transpose materialized.
    cos = jax.lax.dot_general(a, b, (((1,), (1,)), ((), ())),
                              preferred_element_type=jnp.float32)   # (TM, TN)
    score_ref[...] = cos.astype(score_ref.dtype)

    same = lbl_row_ref[...] == lbl_col_ref[...]        # (TM, TN) bool
    e = jnp.exp(cos)                                   # |cos| <= ~1 -> no shift needed

    if last_tile_valid < tn:
        # Batch padding exists; only the last column tile has invalid columns.
        @pl.when(j != nj - 1)
        def _interior():
            l_ref[...] += jnp.sum(e, axis=1, keepdims=True)
            s_ref[...] += jnp.sum(jnp.where(same, cos, 0.0), axis=1, keepdims=True)

        @pl.when(j == nj - 1)
        def _last():
            col_valid = (jax.lax.broadcasted_iota(jnp.int32, (1, tn), 1)
                         < last_tile_valid)
            l_ref[...] += jnp.sum(jnp.where(col_valid, e, 0.0),
                                  axis=1, keepdims=True)
            s_ref[...] += jnp.sum(jnp.where(same & col_valid, cos, 0.0),
                                  axis=1, keepdims=True)
    else:
        # No padding at all: single unmasked path.
        l_ref[...] += jnp.sum(e, axis=1, keepdims=True)
        s_ref[...] += jnp.sum(jnp.where(same, cos, 0.0), axis=1, keepdims=True)

    # Last column tile: per-row loss = count * logsumexp - sum(masked cos).
    @pl.when(j == nj - 1)
    def _finalize():
        lse = jnp.log(l_ref[...])
        rowloss_ref[...] = cnt_ref[...] * lse - s_ref[...]


def _vmem_config():
    """(tile working-set budget, vmem_limit_bytes), generation-aware."""
    cap = 64 * 1024 * 1024                       # conservative default (v7x-safe)
    try:
        info = pltpu.get_tpu_info()
        c = getattr(info, "vmem_capacity_bytes", None)
        if c:
            cap = int(c)
    except Exception:
        pass
    if cap >= 128 * 1024 * 1024:                 # v5e / v6e: plenty of headroom
        return 32 * 1024 * 1024, 96 * 1024 * 1024
    return 18 * 1024 * 1024, 48 * 1024 * 1024    # v7x / unknown: conservative


def _choose_config(b_pad, d, a_isz, b_isz, s_isz, budget):
    """Pick (TM, TN, feature_b_resident).  Bias toward large TM; keep
    grid_i >= 2 where possible (v7x megacore); shrink TN before TM."""
    tm_cands = [c for c in (1024, 512, 256, 128)
                if c <= b_pad and b_pad % c == 0 and (b_pad // c >= 2 or b_pad == 128)]
    tn_cands = [c for c in (256, 128) if c <= b_pad and b_pad % c == 0]
    if not tm_cands:
        tm_cands = [128]
    if not tn_cands:
        tn_cands = [128]

    def est(tm, tn, resident):
        narrow = tm * 128 * 4                    # a (rows,1) array padded to 128 lanes
        e = 2 * tm * d * a_isz                   # feature_a tile (double-buffered)
        e += 2 * (b_pad if resident else tn) * d * b_isz
        e += 2 * tm * tn * s_isz                 # score tile out
        e += 2 * (2 * narrow + 8 * tn * 4)       # lbl_row + count + lbl_col
        e += 2 * narrow                          # rowloss out
        e += 2 * narrow                          # l, s scratches
        e += 3 * tm * tn * 4                     # f32 temporaries (cos/exp/where)
        return e

    def pick(resident):
        for tm in tm_cands:                      # prefer largest TM first
            for tn in tn_cands:                  # then largest TN that still fits
                if est(tm, tn, resident) <= budget:
                    return tm, tn
        return None

    resident = 2 * b_pad * d * b_isz <= budget // 3
    cfg = pick(resident)
    if cfg is None and resident:
        resident = False
        cfg = pick(False)
    if cfg is None:
        cfg = (tm_cands[-1], tn_cands[-1])       # last resort; rely on vmem_limit slack
    return cfg[0], cfg[1], resident


def uniform_loss(label_tensor, feature_a, feature_b=None, temperature=0.07,
                 bf16_matmul=False):
    """Pallas implementation of UniformLoss.forward -> (loss, cos_score)."""
    del temperature  # declared in __init__ but unused in forward
    if feature_b is None:
        feature_b = feature_a
    if feature_a.ndim == 3:
        feature_a = feature_a[..., 0]
        feature_b = feature_b[..., 0]
    if feature_a.ndim != 2 or feature_b.ndim != 2:
        raise RuntimeError

    B, D = feature_a.shape
    # NOTE: cos_score is returned in result_type(inputs) (bf16 in -> bf16 out),
    # matching torch's cosine_similarity dtype behavior.
    score_dtype = jnp.result_type(feature_a.dtype, feature_b.dtype)
    mm_dtype = score_dtype
    if bf16_matmul and mm_dtype == jnp.float32:
        mm_dtype = jnp.bfloat16                  # MXU operands only; acc stays f32

    # --- one-time wrapper work (single pass over B*D / B) --------------------
    def _l2_normalize(x):
        x32 = x.astype(jnp.float32)
        n = jnp.sqrt(jnp.sum(x32 * x32, axis=1, keepdims=True))
        # NOTE: per-operand clamp max(||x||, 1e-8) (differs from torch's product
        # clamp only for near-zero rows, where the cosine is 0 either way).
        return (x32 / jnp.maximum(n, 1e-8)).astype(mm_dtype)

    an = _l2_normalize(feature_a)
    bn = _l2_normalize(feature_b)

    lbl = label_tensor.reshape(-1).astype(jnp.int32)
    # Per-row same-label count (one fused XLA compare+reduce; never touches the
    # kernel's inner loop).
    row_count = jnp.sum((lbl[:, None] == lbl[None, :]).astype(jnp.float32), axis=1)

    # Pad the batch up to a multiple of 128 for lane-dense score stores.
    b_pad = ((B + 127) // 128) * 128
    pad = b_pad - B
    if pad:
        an = jnp.pad(an, ((0, pad), (0, 0)))
        bn = jnp.pad(bn, ((0, pad), (0, 0)))
        lbl = jnp.pad(lbl, (0, pad))
        row_count = jnp.pad(row_count, (0, pad))   # padded rows contribute 0 loss
    lbl_row = lbl.reshape(b_pad, 1)
    lbl_col = lbl.reshape(1, b_pad)
    cnt = row_count.reshape(b_pad, 1)

    # --- tiling / VMEM configuration -----------------------------------------
    budget, vmem_limit = _vmem_config()
    isz = jnp.dtype(mm_dtype).itemsize
    tm, tn, b_resident = _choose_config(
        b_pad, D, isz, isz, jnp.dtype(score_dtype).itemsize, budget)
    grid = (b_pad // tm, b_pad // tn)
    last_tile_valid = B - (grid[1] - 1) * tn     # valid columns in the last col tile

    kernel = functools.partial(_uniform_loss_kernel, tn=tn,
                               last_tile_valid=last_tile_valid,
                               b_resident=b_resident)

    b_spec = (pl.BlockSpec((b_pad, D), lambda i, j: (0, 0)) if b_resident
              else pl.BlockSpec((tn, D), lambda i, j: (j, 0)))

    score_pad, row_loss = pl.pallas_call(
        kernel,
        grid=grid,
        in_specs=[
            pl.BlockSpec((tm, 1), lambda i, j: (i, 0)),   # row labels
            pl.BlockSpec((1, tn), lambda i, j: (0, j)),   # col labels
            pl.BlockSpec((tm, 1), lambda i, j: (i, 0)),   # per-row same-label count
            pl.BlockSpec((tm, D), lambda i, j: (i, 0)),   # feature_a row tile
            b_spec,                                       # feature_b (tile or resident)
        ],
        out_specs=(
            pl.BlockSpec((tm, tn), lambda i, j: (i, j)),  # cos_score tile
            pl.BlockSpec((tm, 1), lambda i, j: (i, 0)),   # per-row loss (written last j)
        ),
        out_shape=(
            jax.ShapeDtypeStruct((b_pad, b_pad), score_dtype),
            jax.ShapeDtypeStruct((b_pad, 1), jnp.float32),
        ),
        scratch_shapes=[
            pltpu.VMEM((tm, 1), jnp.float32),   # running sum(exp(cos))
            pltpu.VMEM((tm, 1), jnp.float32),   # masked cos sum
        ],
        compiler_params=pltpu.CompilerParams(
            dimension_semantics=("parallel", "arbitrary"),
            vmem_limit_bytes=vmem_limit,
        ),
    )(lbl_row, lbl_col, cnt, an, bn)

    loss = jnp.sum(row_loss[:B, 0]) / (B * B)
    return loss, score_pad[:B, :B]


def _reference(label, a, b):
    # Pure-JAX reference mirroring the PyTorch forward.
    a = a.astype(jnp.float32)
    b = b.astype(jnp.float32)
    an = jnp.linalg.norm(a, axis=1, keepdims=True)
    bn = jnp.linalg.norm(b, axis=1, keepdims=True)
    with jax.default_matmul_precision("highest"):
        dots = a @ b.T
    cos = dots / jnp.maximum(an * bn.T, 1e-8)
    logp = jax.nn.log_softmax(cos, axis=1)
    mask = label[:, None] == label[None, :]
    loss = -jnp.sum(jnp.where(mask, logp, 0.0)) / (a.shape[0] ** 2)
    return loss, cos


if __name__ == "__main__":
    key = jax.random.PRNGKey(0)
    k1, k2, k3, k4, k5 = jax.random.split(key, 5)

    # --- small cross-modality case ---------------------------------------
    B, D = 8, 32
    label = jax.random.randint(k1, (B,), 0, 3)
    feat_a = jax.random.normal(k2, (B, D), dtype=jnp.float32)
    feat_b = jax.random.normal(k3, (B, D), dtype=jnp.float32)

    loss, cos_score = uniform_loss(label, feat_a, feat_b)
    loss, cos_score = jax.block_until_ready((loss, cos_score))
    ref_loss, ref_cos = _reference(label, feat_a, feat_b)
    # Tolerances account for the MXU's default f32 matmul precision differing
    # between the tiled kernel and the XLA "highest" reference.
    assert cos_score.shape == (B, B)
    assert jnp.allclose(cos_score, ref_cos, atol=2e-3), "cos_score mismatch"
    assert jnp.allclose(loss, ref_loss, atol=2e-3, rtol=2e-3), "loss mismatch"

    # --- small self-similarity case (feature_b=None) ----------------------
    loss2, cos2 = uniform_loss(label, feat_a)
    loss2, cos2 = jax.block_until_ready((loss2, cos2))
    ref_loss2, ref_cos2 = _reference(label, feat_a, feat_a)
    assert jnp.allclose(cos2, ref_cos2, atol=2e-3)
    assert jnp.allclose(loss2, ref_loss2, atol=2e-3, rtol=2e-3)

    # --- multi-tile / padded case (with one all-zero row) ------------------
    B2, D2 = 300, 64            # pads to 384 -> 3x3 grid of 128x128 tiles
    label2 = jax.random.randint(k4, (B2,), 0, 5)
    feat2 = jax.random.normal(k5, (B2, D2), dtype=jnp.float32)
    feat2 = feat2.at[7].set(0.0)            # exercise the near-zero-norm clamp
    loss3, cos3 = uniform_loss(label2, feat2)
    loss3, cos3 = jax.block_until_ready((loss3, cos3))
    ref_loss3, ref_cos3 = _reference(label2, feat2, feat2)
    assert cos3.shape == (B2, B2)
    assert jnp.allclose(cos3, ref_cos3, atol=2e-3)
    assert jnp.allclose(loss3, ref_loss3, atol=5e-3, rtol=5e-3)

    # --- optional bf16-compute mode for f32 inputs -------------------------
    loss4, cos4 = uniform_loss(label, feat_a, feat_b, bf16_matmul=True)
    loss4, cos4 = jax.block_until_ready((loss4, cos4))
    assert jnp.allclose(cos4, ref_cos, atol=2e-2)
    assert jnp.allclose(loss4, ref_loss, atol=3e-2, rtol=3e-2)

    print("KERNEL_OK")
</pallas_src>

<mosaic_0001>
module attributes {stable_mosaic.version = 11 : i64} {
  func.func @_uniform_loss_kernel(%arg0: i32, %arg1: i32, %arg2: memref<128x1xi32, #tpu.memory_space<vmem>>, %arg3: memref<1x128xi32, #tpu.memory_space<vmem>>, %arg4: memref<128x1xf32, #tpu.memory_space<vmem>>, %arg5: memref<128x32xf32, #tpu.memory_space<vmem>>, %arg6: memref<128x32xf32, #tpu.memory_space<vmem>>, %arg7: memref<128x128xf32, #tpu.memory_space<vmem>>, %arg8: memref<128x1xf32, #tpu.memory_space<vmem>>, %arg9: memref<128x1xf32, #tpu.memory_space<vmem>>, %arg10: memref<128x1xf32, #tpu.memory_space<vmem>>) attributes {dimension_semantics = [#tpu.dimension_semantics<parallel>, #tpu.dimension_semantics<arbitrary>], iteration_bounds = array<i64: 1, 1>, scalar_prefetch = 0 : i64, scratch_operands = 2 : i64, tpu.core_type = #tpu.core_type<tc>, window_params = [{transform_indices = @transform_0, window_bounds = array<i64: 128, 1>}, {transform_indices = @transform_1, window_bounds = array<i64: 1, 128>}, {transform_indices = @transform_2, window_bounds = array<i64: 128, 1>}, {transform_indices = @transform_3, window_bounds = array<i64: 128, 32>}, {pipeline_mode = #tpu.pipeline_mode<synchronous>, transform_indices = @transform_4, window_bounds = array<i64: 128, 32>}, {transform_indices = @transform_5, window_bounds = array<i64: 128, 128>}, {transform_indices = @transform_6, window_bounds = array<i64: 128, 1>}]} {
    %c0_i32 = arith.constant 0 : i32
    %0 = arith.cmpi eq, %arg1, %c0_i32 : i32
    %1 = arith.extui %0 : i1 to i32
    %c0_i32_0 = arith.constant 0 : i32
    %2 = arith.cmpi ne, %1, %c0_i32_0 : i32
    scf.if %2 {
      %cst_15 = arith.constant 0.000000e+00 : f32
      %25 = vector.broadcast %cst_15 : f32 to vector<128x1xf32>
      %c0_16 = arith.constant 0 : index
      %c0_17 = arith.constant 0 : index
      %26 = vector.load %arg9[%c0_16, %c0_17] : memref<128x1xf32, #tpu.memory_space<vmem>>, vector<128x1xf32>
      tpu.vector_store %arg9[%c0_16, %c0_17], %25 {strides = array<i32>} : memref<128x1xf32, #tpu.memory_space<vmem>>, vector<128x1xf32>,
      %cst_18 = arith.constant 0.000000e+00 : f32
      %27 = vector.broadcast %cst_18 : f32 to vector<128x1xf32>
      %c0_19 = arith.constant 0 : index
      %c0_20 = arith.constant 0 : index
      %28 = vector.load %arg10[%c0_19, %c0_20] : memref<128x1xf32, #tpu.memory_space<vmem>>, vector<128x1xf32>
      tpu.vector_store %arg10[%c0_19, %c0_20], %27 {strides = array<i32>} : memref<128x1xf32, #tpu.memory_space<vmem>>, vector<128x1xf32>,
    } else {
    }
    %c0 = arith.constant 0 : index
    %c0_1 = arith.constant 0 : index
    %3 = vector.load %arg5[%c0, %c0_1] : memref<128x32xf32, #tpu.memory_space<vmem>>, vector<128x32xf32>
    %c128_i32 = arith.constant 128 : i32
    %4 = arith.muli %arg1, %c128_i32 : i32
    %5 = tpu.assume_multiple %4, 128 : i32
    %6 = arith.index_cast %5 : i32 to index
    %c0_2 = arith.constant 0 : index
    %7 = vector.load %arg6[%6, %c0_2] : memref<128x32xf32, #tpu.memory_space<vmem>>, vector<128x32xf32>
    %cst = arith.constant dense<0.000000e+00> : vector<128x128xf32>
    %8 = tpu.matmul %3, %7, %cst {dimension_numbers = #tpu.dot_dimension_numbers<[1], [1], [0], [0], [0, 0, 1, 0], [], []>} : vector<128x32xf32>, vector<128x32xf32>, vector<128x128xf32> -> vector<128x128xf32>
    %c0_3 = arith.constant 0 : index
    %c0_4 = arith.constant 0 : index
    %9 = vector.load %arg7[%c0_3, %c0_4] : memref<128x128xf32, #tpu.memory_space<vmem>>, vector<128x128xf32>
    tpu.vector_store %arg7[%c0_3, %c0_4], %8 {strides = array<i32>} : memref<128x128xf32, #tpu.memory_space<vmem>>, vector<128x128xf32>,
    %c0_5 = arith.constant 0 : index
    %c0_6 = arith.constant 0 : index
    %10 = vector.load %arg2[%c0_5, %c0_6] : memref<128x1xi32, #tpu.memory_space<vmem>>, vector<128x1xi32>
    %c0_7 = arith.constant 0 : index
    %c0_8 = arith.constant 0 : index
    %11 = vector.load %arg3[%c0_7, %c0_8] : memref<1x128xi32, #tpu.memory_space<vmem>>, vector<1x128xi32>
    %12 = vector.broadcast %10 : vector<128x1xi32> to vector<128x128xi32>
    %13 = vector.broadcast %11 : vector<1x128xi32> to vector<128x128xi32>
    %14 = arith.cmpi eq, %12, %13 : vector<128x128xi32>
    %15 = math.exp %8 : vector<128x128xf32>
    %c0_i32_9 = arith.constant 0 : i32
    %16 = arith.cmpi ne, %arg1, %c0_i32_9 : i32
    %17 = arith.extui %16 : i1 to i32
    %c0_i32_10 = arith.constant 0 : i32
    %18 = arith.cmpi ne, %17, %c0_i32_10 : i32
    scf.if %18 {
      %c0_15 = arith.constant 0 : index
      %c0_16 = arith.constant 0 : index
      %25 = vector.load %arg9[%c0_15, %c0_16] : memref<128x1xf32, #tpu.memory_space<vmem>>, vector<128x1xf32>
      %cst_17 = arith.constant dense<0.000000e+00> : vector<128xf32>
      %26 = vector.multi_reduction <add>, %15, %cst_17 [1] : vector<128x128xf32> to vector<128xf32>
      %27 = vector.shape_cast %26 : vector<128xf32> to vector<128x1xf32>
      %28 = arith.addf %25, %27 : vector<128x1xf32>
      %c0_18 = arith.constant 0 : index
      %c0_19 = arith.constant 0 : index
      %29 = vector.load %arg9[%c0_18, %c0_19] : memref<128x1xf32, #tpu.memory_space<vmem>>, vector<128x1xf32>
      tpu.vector_store %arg9[%c0_18, %c0_19], %28 {strides = array<i32>} : memref<128x1xf32, #tpu.memory_space<vmem>>, vector<128x1xf32>,
      %c0_20 = arith.constant 0 : index
      %c0_21 = arith.constant 0 : index
      %30 = vector.load %arg10[%c0_20, %c0_21] : memref<128x1xf32, #tpu.memory_space<vmem>>, vector<128x1xf32>
      %cst_22 = arith.constant 0.000000e+00 : f32
      %31 = vector.broadcast %cst_22 : f32 to vector<128x128xf32>
      %32 = arith.select %14, %8, %31 : vector<128x128xi1>, vector<128x128xf32>
      %cst_23 = arith.constant dense<0.000000e+00> : vector<128xf32>
      %33 = vector.multi_reduction <add>, %32, %cst_23 [1] : vector<128x128xf32> to vector<128xf32>
      %34 = vector.shape_cast %33 : vector<128xf32> to vector<128x1xf32>
      %35 = arith.addf %30, %34 : vector<128x1xf32>
      %c0_24 = arith.constant 0 : index
      %c0_25 = arith.constant 0 : index
      %36 = vector.load %arg10[%c0_24, %c0_25] : memref<128x1xf32, #tpu.memory_space<vmem>>, vector<128x1xf32>
      tpu.vector_store %arg10[%c0_24, %c0_25], %35 {strides = array<i32>} : memref<128x1xf32, #tpu.memory_space<vmem>>, vector<128x1xf32>,
    } else {
    }
    %c0_i32_11 = arith.constant 0 : i32
    %19 = arith.cmpi eq, %arg1, %c0_i32_11 : i32
    %20 = arith.extui %19 : i1 to i32
    %c0_i32_12 = arith.constant 0 : i32
    %21 = arith.cmpi ne, %20, %c0_i32_12 : i32
    scf.if %21 {
      %25 = tpu.iota {dimensions = array<i32: 1>} : vector<1x128xi32>
      %c8_i32 = arith.constant 8 : i32
      %26 = vector.broadcast %c8_i32 : i32 to vector<1x128xi32>
      %27 = arith.cmpi slt, %25, %26 : vector<1x128xi32>
      %c0_15 = arith.constant 0 : index
      %c0_16 = arith.constant 0 : index
      %28 = vector.load %arg9[%c0_15, %c0_16] : memref<128x1xf32, #tpu.memory_space<vmem>>, vector<128x1xf32>
      %cst_17 = arith.constant 0.000000e+00 : f32
      %29 = vector.shape_cast %27 : vector<1x128xi1> to vector<1x128xi1>
      %30 = vector.broadcast %29 : vector<1x128xi1> to vector<128x128xi1>
      %31 = vector.broadcast %cst_17 : f32 to vector<128x128xf32>
      %32 = arith.select %30, %15, %31 : vector<128x128xi1>, vector<128x128xf32>
      %cst_18 = arith.constant dense<0.000000e+00> : vector<128xf32>
      %33 = vector.multi_reduction <add>, %32, %cst_18 [1] : vector<128x128xf32> to vector<128xf32>
      %34 = vector.shape_cast %33 : vector<128xf32> to vector<128x1xf32>
      %35 = arith.addf %28, %34 : vector<128x1xf32>
      %c0_19 = arith.constant 0 : index
      %c0_20 = arith.constant 0 : index
      %36 = vector.load %arg9[%c0_19, %c0_20] : memref<128x1xf32, #tpu.memory_space<vmem>>, vector<128x1xf32>
      tpu.vector_store %arg9[%c0_19, %c0_20], %35 {strides = array<i32>} : memref<128x1xf32, #tpu.memory_space<vmem>>, vector<128x1xf32>,
      %c0_21 = arith.constant 0 : index
      %c0_22 = arith.constant 0 : index
      %37 = vector.load %arg10[%c0_21, %c0_22] : memref<128x1xf32, #tpu.memory_space<vmem>>, vector<128x1xf32>
      %38 = vector.broadcast %27 : vector<1x128xi1> to vector<128x128xi1>
      %39 = arith.andi %14, %38 : vector<128x128xi1>
      %cst_23 = arith.constant 0.000000e+00 : f32
      %40 = vector.broadcast %cst_23 : f32 to vector<128x128xf32>
      %41 = arith.select %39, %8, %40 : vector<128x128xi1>, vector<128x128xf32>
      %cst_24 = arith.constant dense<0.000000e+00> : vector<128xf32>
      %42 = vector.multi_reduction <add>, %41, %cst_24 [1] : vector<128x128xf32> to vector<128xf32>
      %43 = vector.shape_cast %42 : vector<128xf32> to vector<128x1xf32>
      %44 = arith.addf %37, %43 : vector<128x1xf32>
      %c0_25 = arith.constant 0 : index
      %c0_26 = arith.constant 0 : index
      %45 = vector.load %arg10[%c0_25, %c0_26] : memref<128x1xf32, #tpu.memory_space<vmem>>, vector<128x1xf32>
      tpu.vector_store %arg10[%c0_25, %c0_26], %44 {strides = array<i32>} : memref<128x1xf32, #tpu.memory_space<vmem>>, vector<128x1xf32>,
    } else {
    }
    %c0_i32_13 = arith.constant 0 : i32
    %22 = arith.cmpi eq, %arg1, %c0_i32_13 : i32
    %23 = arith.extui %22 : i1 to i32
    %c0_i32_14 = arith.constant 0 : i32
    %24 = arith.cmpi ne, %23, %c0_i32_14 : i32
    scf.if %24 {
      %c0_15 = arith.constant 0 : index
      %c0_16 = arith.constant 0 : index
      %25 = vector.load %arg9[%c0_15, %c0_16] : memref<128x1xf32, #tpu.memory_space<vmem>>, vector<128x1xf32>
      %26 = math.log %25 : vector<128x1xf32>
      %c0_17 = arith.constant 0 : index
      %c0_18 = arith.constant 0 : index
      %27 = vector.load %arg4[%c0_17, %c0_18] : memref<128x1xf32, #tpu.memory_space<vmem>>, vector<128x1xf32>
      %28 = arith.mulf %27, %26 : vector<128x1xf32>
      %c0_19 = arith.constant 0 : index
      %c0_20 = arith.constant 0 : index
      %29 = vector.load %arg10[%c0_19, %c0_20] : memref<128x1xf32, #tpu.memory_space<vmem>>, vector<128x1xf32>
      %30 = arith.subf %28, %29 : vector<128x1xf32>
      %c0_21 = arith.constant 0 : index
      %c0_22 = arith.constant 0 : index
      %31 = vector.load %arg8[%c0_21, %c0_22] : memref<128x1xf32, #tpu.memory_space<vmem>>, vector<128x1xf32>
      tpu.vector_store %arg8[%c0_21, %c0_22], %30 {strides = array<i32>} : memref<128x1xf32, #tpu.memory_space<vmem>>, vector<128x1xf32>,
    } else {
    }
    return
  }
  func.func @transform_0(%arg0: i32, %arg1: i32) -> (i32, i32) {
    %c0_i32 = arith.constant 0 : i32
    %c0_i32_0 = arith.constant 0 : i32
    return %arg0, %c0_i32 : i32, i32
  }
  func.func @transform_1(%arg0: i32, %arg1: i32) -> (i32, i32) {
    %c0_i32 = arith.constant 0 : i32
    %c0_i32_0 = arith.constant 0 : i32
    return %c0_i32, %arg1 : i32, i32
  }
  func.func @transform_2(%arg0: i32, %arg1: i32) -> (i32, i32) {
    %c0_i32 = arith.constant 0 : i32
    %c0_i32_0 = arith.constant 0 : i32
    return %arg0, %c0_i32 : i32, i32
  }
  func.func @transform_3(%arg0: i32, %arg1: i32) -> (i32, i32) {
    %c0_i32 = arith.constant 0 : i32
    %c0_i32_0 = arith.constant 0 : i32
    return %arg0, %c0_i32 : i32, i32
  }
  func.func @transform_4(%arg0: i32, %arg1: i32) -> (i32, i32) {
    %c0_i32 = arith.constant 0 : i32
    %c0_i32_0 = arith.constant 0 : i32
    %c0_i32_1 = arith.constant 0 : i32
    return %c0_i32, %c0_i32_0 : i32, i32
  }
  func.func @transform_5(%arg0: i32, %arg1: i32) -> (i32, i32) {
    %c0_i32 = arith.constant 0 : i32
    return %arg0, %arg1 : i32, i32
  }
  func.func @transform_6(%arg0: i32, %arg1: i32) -> (i32, i32) {
    %c0_i32 = arith.constant 0 : i32
    %c0_i32_0 = arith.constant 0 : i32
    return %arg0, %c0_i32 : i32, i32
  }
}

</mosaic_0001>

<bundles_post_ra>
// kernel: tpu_custom_call.1
= control target key start
LH: loop header
LB: loop body
LE: loop exit
PB: predicated region body
PF: predicated region fallthrough
CT: control target
= control target key end

     0   :  { %vm94_vm0 = vcmask 261120   ;;  %v1113_v2 = vmov 0   ;;  %s1714_s0 = inlined_call_operand.vmem [shape: s32[128,1], index: 0, kind: input, shape index: {}]   ;;  %s1715_s1 = inlined_call_operand.vmem [shape: s32[1,128], index: 1, kind: input, shape index: {}]   ;;  %s1716_s2 = inlined_call_operand.vmem [shape: f32[128,1], index: 2, kind: input, shape index: {}]   ;;  %s1717_s3 = inlined_call_operand.vmem [shape: f32[128,32], index: 3, kind: input, shape index: {}]   ;;  %s1718_s4 = inlined_call_operand.vmem [shape: f32[128,32], index: 4, kind: input, shape index: {}]   ;;  %s1719_s5 = inlined_call_operand.hbm [shape: f32[128,128], index: 5, kind: output, shape index: {0}]   ;;  %s1720_s6 = inlined_call_operand.vmem [shape: f32[128,1], index: 6, kind: output, shape index: {1}]  }
   0x1   :  { %v93_v0 = vld [vmem:[%s1718_s4 + $0x78] sm:$0xff]  ;;  %v92_v1 = vld [vmem:[%s1718_s4 + $0x70] sm:$0xff]  ;;  %1019 = vset.pattern.permute.xlu0 %v1113_v2  ;;  %v272_v3 = vld [vmem:[%s1714_s0] sm:$0xff]  ;;  %1021 = vset.pattern.permute.xlu2 %v1113_v2 }
   0x2   :  { %934 = vmatpush.xpose.msk.msra.mxu0 %vm94_vm0, %v93_v0  ;;  %966 = vmatpush.xpose.msk.msra.mxu1 %vm94_vm0, %v93_v0 }
   0x3   :  { %967 = vmatpush.xpose.msk.msra.mxu2 %vm94_vm0, %v93_v0  ;;  %968 = vmatpush.xpose.msk.msra.mxu3 %vm94_vm0, %v93_v0 }
   0x4   :  { %290 = vperm.xlu0 %1019, %v272_v3   ;;  %1020 = vset.pattern.permute.xlu1 %v1113_v2 }
   0x5   :  { %12 = vsyncpa [#allocation5], 0  ;;  %v91_v4 = vld [vmem:[%s1718_s4 + $0x68] sm:$0xff]  ;;  %v90_v5 = vld [vmem:[%s1718_s4 + $0x60] sm:$0xff]  ;;  %v570_v55 = vlaneseq  ;;  %s918_s20 = sshll.u32 %s1719_s5, 4  ;;  %s1115_s21 = smov [#allocation4]   ;;  %s919_s20 = int_to_ptr.hbm [resolvable:$true] %s918_s20 }
   0x6   :  { %935 = vmatpush.xpose.msk.msra.mxu0 %vm94_vm0, %v92_v1  ;;  %969 = vmatpush.xpose.msk.msra.mxu1 %vm94_vm0, %v92_v1  ;;  %v273_v6 = vld [vmem:[%s1714_s0 + $0x8] sm:$0xff]  ;;  %v89_v7 = vld [vmem:[%s1718_s4 + $0x58] sm:$0xff]  ;;  %v88_v8 = vld [vmem:[%s1718_s4 + $0x50] sm:$0xff]  ;;  %s916_s22 = sshll.u32 %s1115_s21, 4  ;;  %s1116_s23 = smov 128   ;;  %s917_s22 = int_to_ptr.vmem [resolvable:$true] %s916_s22 }
   0x7   :  { %970 = vmatpush.xpose.msk.msra.mxu2 %vm94_vm0, %v92_v1  ;;  %971 = vmatpush.xpose.msk.msra.mxu3 %vm94_vm0, %v92_v1  ;;  %v278_v9 = vld [vmem:[%s1714_s0 + $0x30] sm:$0xff]  ;;  %v87_v10 = vld [vmem:[%s1718_s4 + $0x48] sm:$0xff]  ;;  %v86_v11 = vld [vmem:[%s1718_s4 + $0x40] sm:$0xff]  ;;  %v1390_v59 = vand.u32 127, %v570_v55  ;;  %s1117_s24 = smov 8  }
   0x8   :  { %v276_v12 = vld [vmem:[%s1714_s0 + $0x20] sm:$0xff]  ;;  %v281_v13 = vld [vmem:[%s1714_s0 + $0x48] sm:$0xff]  ;;  %v85_v14 = vld [vmem:[%s1718_s4 + $0x38] sm:$0xff] }
   0x9   :  { %302 = vperm.xlu2 %1021, %v276_v12   ;;  %v277_v15 = vld [vmem:[%s1714_s0 + $0x28] sm:$0xff]  ;;  %v274_v16 = vld [vmem:[%s1714_s0 + $0x10] sm:$0xff]  ;;  %v284_v17 = vld [vmem:[%s1714_s0 + $0x60] sm:$0xff]  ;;  %vm572_vm3 = vcmp.lt.s32.totalorder %v1390_v59, 8 }
   0xa   :  { %936 = vmatpush.xpose.msk.msra.mxu0 %vm94_vm0, %v91_v4  ;;  %972 = vmatpush.xpose.msk.msra.mxu1 %vm94_vm0, %v91_v4  ;;  %v84_v18 = vld [vmem:[%s1718_s4 + $0x30] sm:$0xff]  ;;  %v83_v19 = vld [vmem:[%s1718_s4 + $0x28] sm:$0xff]  ;;  %v280_v20 = vld [vmem:[%s1714_s0 + $0x40] sm:$0xff] }
   0xb   :  { %973 = vmatpush.xpose.msk.msra.mxu2 %vm94_vm0, %v91_v4  ;;  %974 = vmatpush.xpose.msk.msra.mxu3 %vm94_vm0, %v91_v4  ;;  %v275_v21 = vld [vmem:[%s1714_s0 + $0x18] sm:$0xff]  ;;  %v82_v23 = vld [vmem:[%s1718_s4 + $0x20] sm:$0xff]  ;;  %v80_v27 = vld [vmem:[%s1718_s4 + $0x10] sm:$0xff] }
   0xc   :  { %293 = vperm.xlu0 %1019, %v273_v6   ;;  %296 = vperm.xlu1 %1020, %v274_v16   ;;  %v287_v22 = vld [vmem:[%s1714_s0 + $0x78] sm:$0xff]  ;;  %v79_v28 = vld [vmem:[%s1718_s4 + $0x8] sm:$0xff]  ;;  %v286_v29 = vld [vmem:[%s1714_s0 + $0x70] sm:$0xff] }
   0xd   :  { %v81_v24 = vld [vmem:[%s1718_s4 + $0x18] sm:$0xff]  ;;  %v78_v30 = vld [vmem:[%s1718_s4] sm:$0xff]  ;;  %v282_v31 = vld [vmem:[%s1714_s0 + $0x50] sm:$0xff] }
   0xe   :  { %937 = vmatpush.xpose.msk.msra.mxu0 %vm94_vm0, %v90_v5  ;;  %975 = vmatpush.xpose.msk.msra.mxu1 %vm94_vm0, %v90_v5  ;;  %v283_v25 = vld [vmem:[%s1714_s0 + $0x58] sm:$0xff]  ;;  %v60_v32 = vld [vmem:[%s1717_s3] sm:$0xff]  ;;  %v285_v36 = vld [vmem:[%s1714_s0 + $0x68] sm:$0xff] }
   0xf   :  { %976 = vmatpush.xpose.msk.msra.mxu2 %vm94_vm0, %v90_v5  ;;  %977 = vmatpush.xpose.msk.msra.mxu3 %vm94_vm0, %v90_v5  ;;  %v279_v26 = vld [vmem:[%s1714_s0 + $0x38] sm:$0xff]  ;;  %v64_v33 = vld [vmem:[%s1717_s3 + $0x20] sm:$0xff]  ;;  %v61_v37 = vld [vmem:[%s1717_s3 + $0x8] sm:$0xff] }
  0x10   :  { %v68_v34 = vld [vmem:[%s1717_s3 + $0x40] sm:$0xff]  ;;  %v65_v38 = vld [vmem:[%s1717_s3 + $0x28] sm:$0xff]  ;;  %v66_v41 = vld [vmem:[%s1717_s3 + $0x30] sm:$0xff] }
  0x11   :  { %305 = vperm.xlu2 %1021, %v277_v15   ;;  %v72_v35 = vld [vmem:[%s1717_s3 + $0x60] sm:$0xff]  ;;  %v69_v39 = vld [vmem:[%s1717_s3 + $0x48] sm:$0xff]  ;;  %v62_v42 = vld [vmem:[%s1717_s3 + $0x10] sm:$0xff]  ;;  %v1114_v15 = vmov 0.0  }
  0x12   :  { %938 = vmatpush.xpose.msk.msra.mxu0 %vm94_vm0, %v89_v7  ;;  %978 = vmatpush.xpose.msk.msra.mxu1 %vm94_vm0, %v89_v7  ;;  %v73_v40 = vld [vmem:[%s1717_s3 + $0x68] sm:$0xff]  ;;  %v70_v43 = vld [vmem:[%s1717_s3 + $0x50] sm:$0xff]  ;;  %v63_v45 = vld [vmem:[%s1717_s3 + $0x18] sm:$0xff] }
  0x13   :  { %979 = vmatpush.xpose.msk.msra.mxu2 %vm94_vm0, %v89_v7  ;;  %980 = vmatpush.xpose.msk.msra.mxu3 %vm94_vm0, %v89_v7  ;;  %v74_v44 = vld [vmem:[%s1717_s3 + $0x70] sm:$0xff]  ;;  %v67_v46 = vld [vmem:[%s1717_s3 + $0x38] sm:$0xff]  ;;  %v1388_v57 = vld [vmem:[%s1715_s1] ss:$0 sm:$0xff] }
  0x14   :  { %308 = vperm.xlu0 %1019, %v278_v9   ;;  %299 = vperm.xlu1 %1020, %v275_v21   ;;  %v71_v47 = vld [vmem:[%s1717_s3 + $0x58] sm:$0xff] }
  0x15   :  { %v75_v48 = vld [vmem:[%s1717_s3 + $0x78] sm:$0xff] }
  0x16   :  { %939 = vmatpush.xpose.msk.msra.mxu0 %vm94_vm0, %v88_v8  ;;  %981 = vmatpush.xpose.msk.msra.mxu1 %vm94_vm0, %v88_v8 }
  0x17   :  { %982 = vmatpush.xpose.msk.msra.mxu2 %vm94_vm0, %v88_v8  ;;  %983 = vmatpush.xpose.msk.msra.mxu3 %vm94_vm0, %v88_v8 }
  0x19   :  { %314 = vperm.xlu2 %1021, %v280_v20  }
  0x1a   :  { %940 = vmatpush.xpose.msk.msra.mxu0 %vm94_vm0, %v87_v10  ;;  %984 = vmatpush.xpose.msk.msra.mxu1 %vm94_vm0, %v87_v10 }
  0x1b   :  { %985 = vmatpush.xpose.msk.msra.mxu2 %vm94_vm0, %v87_v10  ;;  %986 = vmatpush.xpose.msk.msra.mxu3 %vm94_vm0, %v87_v10 }
  0x1c   :  { %317 = vperm.xlu0 %1019, %v281_v13   ;;  %311 = vperm.xlu1 %1020, %v279_v26  }
  0x1e   :  { %941 = vmatpush.xpose.msk.msra.mxu0 %vm94_vm0, %v86_v11  ;;  %987 = vmatpush.xpose.msk.msra.mxu1 %vm94_vm0, %v86_v11 }
  0x1f   :  { %988 = vmatpush.xpose.msk.msra.mxu2 %vm94_vm0, %v86_v11  ;;  %989 = vmatpush.xpose.msk.msra.mxu3 %vm94_vm0, %v86_v11 }
  0x21   :  { %323 = vperm.xlu2 %1021, %v283_v25  }
  0x22   :  { %942 = vmatpush.xpose.msk.msra.mxu0 %vm94_vm0, %v85_v14  ;;  %990 = vmatpush.xpose.msk.msra.mxu1 %vm94_vm0, %v85_v14 }
  0x23   :  { %991 = vmatpush.xpose.msk.msra.mxu2 %vm94_vm0, %v85_v14  ;;  %992 = vmatpush.xpose.msk.msra.mxu3 %vm94_vm0, %v85_v14 }
  0x24   :  { %326 = vperm.xlu0 %1019, %v284_v17   ;;  %320 = vperm.xlu1 %1020, %v282_v31  }
  0x26   :  { %943 = vmatpush.xpose.msk.msra.mxu0 %vm94_vm0, %v84_v18  ;;  %993 = vmatpush.xpose.msk.msra.mxu1 %vm94_vm0, %v84_v18 }
  0x27   :  { %994 = vmatpush.xpose.msk.msra.mxu2 %vm94_vm0, %v84_v18  ;;  %995 = vmatpush.xpose.msk.msra.mxu3 %vm94_vm0, %v84_v18 }
  0x29   :  { %332 = vperm.xlu2 %1021, %v286_v29  }
  0x2a   :  { %944 = vmatpush.xpose.msk.msra.mxu0 %vm94_vm0, %v83_v19  ;;  %996 = vmatpush.xpose.msk.msra.mxu1 %vm94_vm0, %v83_v19 }
  0x2b   :  { %997 = vmatpush.xpose.msk.msra.mxu2 %vm94_vm0, %v83_v19  ;;  %998 = vmatpush.xpose.msk.msra.mxu3 %vm94_vm0, %v83_v19 }
  0x2c   :  { %335 = vperm.xlu0 %1019, %v287_v22   ;;  %329 = vperm.xlu1 %1020, %v285_v36  }
  0x2e   :  { %945 = vmatpush.xpose.msk.msra.mxu0 %vm94_vm0, %v82_v23  ;;  %999 = vmatpush.xpose.msk.msra.mxu1 %vm94_vm0, %v82_v23 }
  0x2f   :  { %1000 = vmatpush.xpose.msk.msra.mxu2 %vm94_vm0, %v82_v23  ;;  %1001 = vmatpush.xpose.msk.msra.mxu3 %vm94_vm0, %v82_v23 }
  0x32   :  { %946 = vmatpush.xpose.msk.msra.mxu0 %vm94_vm0, %v81_v24  ;;  %1002 = vmatpush.xpose.msk.msra.mxu1 %vm94_vm0, %v81_v24 }
  0x33   :  { %1003 = vmatpush.xpose.msk.msra.mxu2 %vm94_vm0, %v81_v24  ;;  %1004 = vmatpush.xpose.msk.msra.mxu3 %vm94_vm0, %v81_v24 }
  0x36   :  { %947 = vmatpush.xpose.msk.msra.mxu0 %vm94_vm0, %v80_v27  ;;  %1005 = vmatpush.xpose.msk.msra.mxu1 %vm94_vm0, %v80_v27 }
  0x37   :  { %1006 = vmatpush.xpose.msk.msra.mxu2 %vm94_vm0, %v80_v27  ;;  %1007 = vmatpush.xpose.msk.msra.mxu3 %vm94_vm0, %v80_v27 }
  0x3a   :  { %948 = vmatpush.xpose.msk.msra.mxu0 %vm94_vm0, %v79_v28  ;;  %1008 = vmatpush.xpose.msk.msra.mxu1 %vm94_vm0, %v79_v28 }
  0x3b   :  { %1009 = vmatpush.xpose.msk.msra.mxu2 %vm94_vm0, %v79_v28  ;;  %1010 = vmatpush.xpose.msk.msra.mxu3 %vm94_vm0, %v79_v28 }
  0x3e   :  { %949 = vmatpush.xpose.msk.msra.mxu0 %vm94_vm0, %v78_v30  ;;  %1011 = vmatpush.xpose.msk.msra.mxu1 %vm94_vm0, %v78_v30 }
  0x3f   :  { %1012 = vmatpush.xpose.msk.msra.mxu2 %vm94_vm0, %v78_v30  ;;  %1013 = vmatpush.xpose.msk.msra.mxu3 %vm94_vm0, %v78_v30 }
  0x41   :  { %950 = vmatmul.msk.f32.vlgmr.msra.gmra.mxu0 %vm94_vm0, %v60_v32  ;;  %954 = vmatmul.msk.f32.vlgmr.msra.gmra.mxu1 %vm94_vm0, %v64_v33 }
  0x42   :  { %958 = vmatmul.msk.f32.vlgmr.msra.gmra.mxu2 %vm94_vm0, %v68_v34  ;;  %962 = vmatmul.msk.f32.vlgmr.msra.gmra.mxu3 %vm94_vm0, %v72_v35 }
  0x49   :  { %951 = vmatmul.msk.f32.gmra.mxu0 %vm94_vm0, %v61_v37  ;;  %955 = vmatmul.msk.f32.gmra.mxu1 %vm94_vm0, %v65_v38 }
  0x4a   :  { %959 = vmatmul.msk.f32.gmra.mxu2 %vm94_vm0, %v69_v39  ;;  %963 = vmatmul.msk.f32.gmra.mxu3 %vm94_vm0, %v73_v40 }
  0x51   :  { %956 = vmatmul.msk.f32.gmra.mxu1 %vm94_vm0, %v66_v41  ;;  %952 = vmatmul.msk.f32.gmra.mxu0 %vm94_vm0, %v62_v42 }
  0x52   :  { %960 = vmatmul.msk.f32.gmra.mxu2 %vm94_vm0, %v70_v43  ;;  %964 = vmatmul.msk.f32.gmra.mxu3 %vm94_vm0, %v74_v44 }
  0x59   :  { %953 = vmatmul.msk.f32.gmra.mxu0 %vm94_vm0, %v63_v45  ;;  %957 = vmatmul.msk.f32.gmra.mxu1 %vm94_vm0, %v67_v46 }
  0x5a   :  { %961 = vmatmul.msk.f32.gmra.mxu2 %vm94_vm0, %v71_v47  ;;  %965 = vmatmul.msk.f32.gmra.mxu3 %vm94_vm0, %v75_v48 }
  0x63   :  { %v303_v53 = vpop.permute.xlu2 %302 }
  0x64   :  { %vm342_vm2 = vcmp.eq.s32.totalorder %v303_v53, %v1388_v57 }
  0x65   :  { %vm692_vm5 = vmand %vm342_vm2, %vm572_vm3 }
  0x6b   :  { %v306_v58 = vpop.permute.xlu2 %305 }
  0x6c   :  { %vm343_vm12 = vcmp.eq.s32.totalorder %v306_v58, %v1388_v57 }
  0x6d   :  { %vm693_vm14 = vmand %vm343_vm12, %vm572_vm3 }
  0x73   :  { %v315_v3 = vpop.permute.xlu2 %314 }
  0x74   :  { %vm346_vm6 = vcmp.eq.s32.totalorder %v315_v3, %v1388_v57 }
  0x75   :  { %vm696_vm9 = vmand %vm346_vm6, %vm572_vm3 }
  0x76   :  { %v291_v49 = vpop.permute.xlu0 %290 }
  0x77   :  { %vm338_vm1 = vcmp.eq.s32.totalorder %v291_v49, %v1388_v57 }
  0x78   :  { %vm688_vm4 = vmand %vm338_vm1, %vm572_vm3 }
  0x7e   :  { %v1377_v50 = vpop.permute.xlu1 %296  ;;  %v294_v51 = vpop.permute.xlu0 %293 }
  0x7f   :  { %vm339_vm7 = vcmp.eq.s32.totalorder %v294_v51, %v1388_v57  ;;  %vm340_vm2 = vcmp.eq.s32.totalorder %v1377_v50, %v1388_v57 }
  0x80   :  { %vm689_vm10 = vmand %vm339_vm7, %vm572_vm3 }
  0x86   :  { %v1379_v52 = vpop.permute.xlu1 %299  ;;  %v1381_v54 = vpop.permute.xlu0 %308 }
  0x8e   :  { %v1383_v56 = vpop.permute.xlu1 %311  ;;  %v1392_v60 = vpop.permute.xlu0 %317 }
  0x8f   :  { %vm347_vm0 = vcmp.eq.s32.totalorder %v1392_v60, %v1388_v57  ;;  %vm345_vm7 = vcmp.eq.s32.totalorder %v1383_v56, %v1388_v57 }
  0x90   :  { %vm697_vm1 = vmand %vm347_vm0, %vm572_vm3 }
  0x96   :  { %v1399_v61 = vpop.permute.xlu1 %320  ;;  %v327_v4 = vpop.permute.xlu0 %326 }
  0x97   :  { %vm350_vm8 = vcmp.eq.s32.totalorder %v327_v4, %v1388_v57  ;;  %vm348_vm12 = vcmp.eq.s32.totalorder %v1399_v61, %v1388_v57 }
  0x98   :  { %vm1418_vm11 = vmand %vm350_vm8, %vm572_vm3 }
  0x99   :  { %vm695_vm8 = vmand %vm345_vm7, %vm572_vm3 }
  0x9e   :  { %v330_v17 = vpop.permute.xlu1 %329 }
  0x9f   :  { %vm351_vm13 = vcmp.eq.s32.totalorder %v330_v17, %v1388_v57 }
  0xa0   :  { %vm1435_vm15 = vmand %vm351_vm13, %vm572_vm3 }
  0xbe   :  { %v208_v62 = vpop.f32.mrf.mxu0  ;;  %v220_v63 = vpop.f32.mrf.mxu1 }
  0xbf   :  { %256 = vst [vmem:[#allocation4] sm:$0xff] %v208_v62  ;;  %v354_v0 = vmul.f32 1.442695, %v208_v62  ;;  %v708_v1 = vsel %vm692_vm5, %v220_v63, 0.0  ;;  %v704_v2 = vsel %vm688_vm4, %v208_v62, 0.0  ;;  %vm690_vm4 = vmand %vm340_vm2, %vm572_vm3  ;;  %vm344_vm5 = vcmp.eq.s32.totalorder %v1381_v54, %v1388_v57 }
  0xc0   :  { %260 = vst [vmem:[#allocation4 + $0x20] sm:$0xff] %v220_v63  ;;  %728 = vadd.xlane.f32.xlu2 %v708_v1  ;;  %720 = vadd.xlane.f32.xlu1 %v704_v2  ;;  %v362_v5 = vmul.f32 1.442695, %v220_v63  ;;  %vm694_vm6 = vmand %vm344_vm5, %vm572_vm3 }
  0xc1   :  { %1023 = vpow2.f32 %v354_v0 }
  0xc2   :  { %1025 = vpow2.f32 %v362_v5 }
  0xc5   :  { %v232_v6 = vpop.f32.mrf.mxu2  ;;  %v1406_v7 = vpop.f32.mrf.mxu3 }
  0xc6   :  { %264 = vst [vmem:[#allocation4 + $0x40] sm:$0xff] %v232_v6  ;;  %v370_v8 = vmul.f32 1.442695, %v232_v6  ;;  %v712_v9 = vsel %vm696_vm9, %v232_v6, 0.0  ;;  %v211_v10 = vpop.f32.mrf.mxu0  ;;  %v223_v11 = vpop.f32.mrf.mxu1  ;;  %v378_v13 = vmul.f32 1.442695, %v1406_v7  ;;  %vm341_vm9 = vcmp.eq.s32.totalorder %v1379_v52, %v1388_v57 }
  0xc7   :  { %v1024_v12 = vpop.eup %1023  ;;  %268 = vst [vmem:[#allocation4 + $0x60] sm:$0xff] %v1406_v7  ;;  %736 = vadd.xlane.f32.xlu0 %v712_v9  ;;  %v705_v14 = vsel %vm689_vm10, %v211_v10, 0.0  ;;  %v716_v18 = vsel %vm1418_vm11, %v1406_v7, 0.0  ;;  %v356_v19 = vmul.f32 1.442695, %v211_v10  ;;  %v709_v24 = vsel %vm693_vm14, %v223_v11, 0.0  ;;  %vm691_vm10 = vmand %vm341_vm9, %vm572_vm3 }
  0xc8   :  { %1027 = vpow2.f32 %v370_v8  ;;  %257 = vst [vmem:[#allocation4 + $0x8] sm:$0xff] %v211_v10  ;;  %722 = vadd.xlane.f32.xlu2 %v705_v14  ;;  %v591_v16 = vsel %vm572_vm3, %v1024_v12, 0.0  ;;  %v1026_v20 = vpop.eup %1025  ;;  %v364_v32 = vmul.f32 1.442695, %v223_v11  ;;  %vm698_vm14 = vmand %vm348_vm12, %vm572_vm3 }
  0xc9   :  { %261 = vst [vmem:[#allocation4 + $0x28] sm:$0xff] %v223_v11  ;;  %607 = vadd.xlane.f32.xlu1 %v591_v16  ;;  %1029 = vpow2.f32 %v378_v13  ;;  %v595_v29 = vsel %vm572_vm3, %v1026_v20, 0.0 }
  0xca   :  { %1031 = vpow2.f32 %v356_v19  ;;  %v324_v19 = vpop.permute.xlu2 %323 }
  0xcb   :  { %1033 = vpow2.f32 %v364_v32  ;;  %vm349_vm13 = vcmp.eq.s32.totalorder %v324_v19, %v1388_v57  ;;  %v836_v19 = vld [vmem:[%s1716_s2 + $0x20] sm:$0xff] }
  0xcc   :  { %vm699_vm0 = vmand %vm349_vm13, %vm572_vm3 }
  0xcd   :  { %v235_v21 = vpop.f32.mrf.mxu2  ;;  %v1429_v22 = vpop.f32.mrf.mxu3 }
  0xce   :  { %v1028_v23 = vpop.eup %1027  ;;  %265 = vst [vmem:[#allocation4 + $0x48] sm:$0xff] %v235_v21  ;;  %v226_v25 = vpop.f32.mrf.mxu1  ;;  %v717_v31 = vsel %vm1435_vm15, %v1429_v22, 0.0  ;;  %v372_v39 = vmul.f32 1.442695, %v235_v21  ;;  %v713_v41 = vsel %vm697_vm1, %v235_v21, 0.0 }
  0xcf   :  { %v214_v26 = vpop.f32.mrf.mxu0  ;;  %269 = vst [vmem:[#allocation4 + $0x68] sm:$0xff] %v1429_v22  ;;  %730 = vadd.xlane.f32.xlu0 %v709_v24  ;;  %v599_v28 = vsel %vm572_vm3, %v1028_v23, 0.0  ;;  %v1030_v30 = vpop.eup %1029  ;;  %v380_v42 = vmul.f32 1.442695, %v1429_v22  ;;  %v710_v49 = vsel %vm694_vm6, %v226_v25, 0.0  ;;  %vm27_vm6 = vcmask 7168  }
  0xd0   :  { %262 = vst [vmem:[#allocation4 + $0x30] sm:$0xff] %v226_v25  ;;  %623 = vadd.xlane.f32.xlu2 %v599_v28  ;;  %v1032_v33 = vpop.eup %1031  ;;  %v603_v34 = vsel %vm572_vm3, %v1030_v30, 0.0  ;;  %1035 = vpow2.f32 %v372_v39  ;;  %v706_v46 = vsel %vm690_vm4, %v214_v26, 0.0  ;;  %v358_v50 = vmul.f32 1.442695, %v214_v26 }
  0xd1   :  { %258 = vst [vmem:[#allocation4 + $0x10] sm:$0xff] %v214_v26  ;;  %615 = vadd.xlane.f32.xlu1 %v595_v29  ;;  %v592_v38 = vsel %vm572_vm3, %v1032_v33, 0.0  ;;  %v1034_v43 = vpop.eup %1033  ;;  %1037 = vpow2.f32 %v380_v42  ;;  %v366_v58 = vmul.f32 1.442695, %v226_v25  ;;  %v336_v26 = vpop.permute.xlu0 %335 }
  0xd2   :  { %v596_v47 = vsel %vm572_vm3, %v1034_v43, 0.0  ;;  %v333_v24 = vpop.permute.xlu2 %332  ;;  %vm353_vm2 = vcmp.eq.s32.totalorder %v336_v26, %v1388_v57  ;;  %48 = vst.msk [vmem:[#allocation3 + $0x20] sm:$0xff] %vm27_vm6, %v1114_v15 }
  0xd3   :  { %vm352_vm1 = vcmp.eq.s32.totalorder %v333_v24, %v1388_v57  ;;  %vm703_vm5 = vmand %vm353_vm2, %vm572_vm3  ;;  %28 = vst.msk [vmem:[#allocation2] sm:$0xff] %vm27_vm6, %v1114_v15 }
  0xd4   :  { %vm702_vm4 = vmand %vm352_vm1, %vm572_vm3  ;;  %29 = vst.msk [vmem:[#allocation2 + $0x8] sm:$0xff] %vm27_vm6, %v1114_v15 }
  0xd5   :  { %v1451_v35 = vpop.f32.mrf.mxu2  ;;  %v1453_v36 = vpop.f32.mrf.mxu3  ;;  %30 = vst.msk [vmem:[#allocation2 + $0x10] sm:$0xff] %vm27_vm6, %v1114_v15 }
  0xd6   :  { %266 = vst [vmem:[#allocation4 + $0x50] sm:$0xff] %v1451_v35  ;;  %v229_v40 = vpop.f32.mrf.mxu1  ;;  %v382_v48 = vmul.f32 1.442695, %v1453_v36  ;;  %v1036_v51 = vpop.eup %1035  ;;  %v374_v56 = vmul.f32 1.442695, %v1451_v35  ;;  %v714_v25 = vsel %vm698_vm14, %v1451_v35, 0.0 }
  0xd7   :  { %270 = vst [vmem:[#allocation4 + $0x70] sm:$0xff] %v1453_v36  ;;  %631 = vadd.xlane.f32.xlu0 %v603_v34  ;;  %v217_v37 = vpop.f32.mrf.mxu0  ;;  %v1038_v53 = vpop.eup %1037  ;;  %v600_v54 = vsel %vm572_vm3, %v1036_v51, 0.0  ;;  %v711_v60 = vsel %vm695_vm8, %v229_v40, 0.0  ;;  %v368_v9 = vmul.f32 1.442695, %v229_v40  ;;  %v718_v61 = vsel %vm702_vm4, %v1453_v36, 0.0 }
  0xd8   :  { %259 = vst [vmem:[#allocation4 + $0x18] sm:$0xff] %v217_v37  ;;  %609 = vadd.xlane.f32.xlu2 %v592_v38  ;;  %1039 = vpow2.f32 %v382_v48  ;;  %v604_v55 = vsel %vm572_vm3, %v1038_v53, 0.0  ;;  %v360_v62 = vmul.f32 1.442695, %v217_v37  ;;  %v707_v52 = vsel %vm691_vm10, %v217_v37, 0.0 }
  0xd9   :  { %263 = vst [vmem:[#allocation4 + $0x38] sm:$0xff] %v229_v40  ;;  %738 = vadd.xlane.f32.xlu1 %v713_v41  ;;  %1041 = vpow2.f32 %v358_v50  ;;  %v676_v57 = vld [vmem:[#allocation3 + $0x20] sm:$0xff] }
  0xda   :  { %1043 = vpow2.f32 %v366_v58  ;;  %31 = vst.msk [vmem:[#allocation2 + $0x18] sm:$0xff] %vm27_vm6, %v1114_v15  ;;  %v573_v32 = vld [vmem:[#allocation2] sm:$0xff] }
  0xdb   :  { %1045 = vpow2.f32 %v360_v62  ;;  %32 = vst.msk [vmem:[#allocation2 + $0x20] sm:$0xff] %vm27_vm6, %v1114_v15  ;;  %v832_v62 = vld [vmem:[%s1716_s2] sm:$0xff] }
  0xdc   :  { %1047 = vpow2.f32 %v374_v56  ;;  %33 = vst.msk [vmem:[#allocation2 + $0x28] sm:$0xff] %vm27_vm6, %v1114_v15 }
  0xdd   :  { %v1468_v44 = vpop.f32.mrf.mxu2  ;;  %v1471_v45 = vpop.f32.mrf.mxu3  ;;  %34 = vst.msk [vmem:[#allocation2 + $0x30] sm:$0xff] %vm27_vm6, %v1114_v15 }
  0xde   :  { %267 = vst [vmem:[#allocation4 + $0x58] sm:$0xff] %v1468_v44  ;;  %v1040_v63 = vpop.eup %1039  ;;  %v384_v3 = vmul.f32 1.442695, %v1471_v45  ;;  %v376_v4 = vmul.f32 1.442695, %v1468_v44  ;;  %v715_v23 = vsel %vm699_vm0, %v1468_v44, 0.0 }
  0xdf   :  { %271 = vst [vmem:[#allocation4 + $0x78] sm:$0xff] %v1471_v45  ;;  %724 = vadd.xlane.f32.xlu0 %v706_v46  ;;  %v1042_v0 = vpop.eup %1041  ;;  %v605_v1 = vsel %vm572_vm3, %v1040_v63, 0.0  ;;  %v719_v7 = vsel %vm703_vm5, %v1471_v45, 0.0 }
  0xe0   :  { %617 = vadd.xlane.f32.xlu2 %v596_v47  ;;  %v593_v2 = vsel %vm572_vm3, %v1042_v0, 0.0  ;;  %v1044_v5 = vpop.eup %1043  ;;  %1049 = vpow2.f32 %v384_v3  ;;  %924 = dma.vmem_to_hbm [thread:$0]  %s917_s22, 2048, %s919_s20, [#allocation5], %s1116_s23, %s1116_s23, %s1117_s24   ;;  %35 = vst.msk [vmem:[#allocation2 + $0x38] sm:$0xff] %vm27_vm6, %v1114_v15 }
  0xe1   :  { %732 = vadd.xlane.f32.xlu1 %v710_v49  ;;  %v1046_v6 = vpop.eup %1045  ;;  %1051 = vpow2.f32 %v376_v4  ;;  %v597_v11 = vsel %vm572_vm3, %v1044_v5, 0.0  ;;  %36 = vst.msk [vmem:[#allocation2 + $0x40] sm:$0xff] %vm27_vm6, %v1114_v15  ;;  %v574_v49 = vld [vmem:[#allocation2 + $0x8] sm:$0xff] }
  0xe2   :  { %v1048_v8 = vpop.eup %1047  ;;  %v594_v10 = vsel %vm572_vm3, %v1046_v6, 0.0  ;;  %1053 = vpow2.f32 %v368_v9  ;;  %37 = vst.msk [vmem:[#allocation2 + $0x48] sm:$0xff] %vm27_vm6, %v1114_v15  ;;  %v577_v41 = vld [vmem:[#allocation2 + $0x20] sm:$0xff] }
  0xe3   :  { %v601_v12 = vsel %vm572_vm3, %v1048_v8, 0.0  ;;  %38 = vst.msk [vmem:[#allocation2 + $0x50] sm:$0xff] %vm27_vm6, %v1114_v15 }
  0xe4   :  { %39 = vst.msk [vmem:[#allocation2 + $0x58] sm:$0xff] %vm27_vm6, %v1114_v15 }
  0xe5   :  { %40 = vst.msk [vmem:[#allocation2 + $0x60] sm:$0xff] %vm27_vm6, %v1114_v15 }
  0xe6   :  { %v1050_v13 = vpop.eup %1049  ;;  %41 = vst.msk [vmem:[#allocation2 + $0x68] sm:$0xff] %vm27_vm6, %v1114_v15 }
  0xe7   :  { %625 = vadd.xlane.f32.xlu0 %v600_v54  ;;  %v1052_v14 = vpop.eup %1051  ;;  %v606_v16 = vsel %vm572_vm3, %v1050_v13, 0.0  ;;  %42 = vst.msk [vmem:[#allocation2 + $0x70] sm:$0xff] %vm27_vm6, %v1114_v15 }
  0xe8   :  { %734 = vadd.xlane.f32.xlu2 %v711_v60  ;;  %v1054_v17 = vpop.eup %1053  ;;  %v602_v20 = vsel %vm572_vm3, %v1052_v14, 0.0  ;;  %43 = vst.msk [vmem:[#allocation2 + $0x78] sm:$0xff] %vm27_vm6, %v1114_v15  ;;  %v581_v39 = vld [vmem:[#allocation2 + $0x40] sm:$0xff] }
  0xe9   :  { %633 = vadd.xlane.f32.xlu1 %v604_v55  ;;  %v598_v21 = vsel %vm572_vm3, %v1054_v17, 0.0  ;;  %44 = vst.msk [vmem:[#allocation3] sm:$0xff] %vm27_vm6, %v1114_v15 }
  0xea   :  { %45 = vst.msk [vmem:[#allocation3 + $0x8] sm:$0xff] %vm27_vm6, %v1114_v15 }
  0xeb   :  { %46 = vst.msk [vmem:[#allocation3 + $0x10] sm:$0xff] %vm27_vm6, %v1114_v15 }
  0xec   :  { %47 = vst.msk [vmem:[#allocation3 + $0x18] sm:$0xff] %vm27_vm6, %v1114_v15  ;;  %v585_v48 = vld [vmem:[#allocation2 + $0x60] sm:$0xff] }
  0xed   :  { %49 = vst.msk [vmem:[#allocation3 + $0x28] sm:$0xff] %vm27_vm6, %v1114_v15 }
  0xee   :  { %50 = vst.msk [vmem:[#allocation3 + $0x30] sm:$0xff] %vm27_vm6, %v1114_v15 }
  0xef   :  { %611 = vadd.xlane.f32.xlu0 %v593_v2  ;;  %51 = vst.msk [vmem:[#allocation3 + $0x38] sm:$0xff] %vm27_vm6, %v1114_v15 }
  0xf0   :  { %635 = vadd.xlane.f32.xlu2 %v605_v1  ;;  %52 = vst.msk [vmem:[#allocation3 + $0x40] sm:$0xff] %vm27_vm6, %v1114_v15  ;;  %v672_v59 = vld [vmem:[#allocation3] sm:$0xff] }
  0xf1   :  { %726 = vadd.xlane.f32.xlu1 %v707_v52  ;;  %53 = vst.msk [vmem:[#allocation3 + $0x48] sm:$0xff] %vm27_vm6, %v1114_v15  ;;  %v673_v30 = vld [vmem:[#allocation3 + $0x8] sm:$0xff] }
  0xf2   :  { %54 = vst.msk [vmem:[#allocation3 + $0x50] sm:$0xff] %vm27_vm6, %v1114_v15  ;;  %v674_v3 = vld [vmem:[#allocation3 + $0x10] sm:$0xff]  ;;  %v578_v52 = vld [vmem:[#allocation2 + $0x28] sm:$0xff] }
  0xf3   :  { %55 = vst.msk [vmem:[#allocation3 + $0x58] sm:$0xff] %vm27_vm6, %v1114_v15 }
  0xf4   :  { %56 = vst.msk [vmem:[#allocation3 + $0x60] sm:$0xff] %vm27_vm6, %v1114_v15  ;;  %v677_v38 = vld [vmem:[#allocation3 + $0x28] sm:$0xff] }
  0xf5   :  { %57 = vst.msk [vmem:[#allocation3 + $0x68] sm:$0xff] %vm27_vm6, %v1114_v15  ;;  %v678_v8 = vld [vmem:[#allocation3 + $0x30] sm:$0xff] }
  0xf6   :  { %58 = vst.msk [vmem:[#allocation3 + $0x70] sm:$0xff] %vm27_vm6, %v1114_v15 }
  0xf7   :  { %619 = vadd.xlane.f32.xlu0 %v597_v11  ;;  %59 = vst.msk [vmem:[#allocation3 + $0x78] sm:$0xff] %vm27_vm6, %v1114_v15  ;;  %v680_v29 = vld [vmem:[#allocation3 + $0x40] sm:$0xff] }
  0xf8   :  { %613 = vadd.xlane.f32.xlu2 %v594_v10  ;;  %v681_v51 = vld [vmem:[#allocation3 + $0x48] sm:$0xff] }
  0xf9   :  { %627 = vadd.xlane.f32.xlu1 %v601_v12  ;;  %v840_v12 = vld [vmem:[%s1716_s2 + $0x40] sm:$0xff] }
  0xff   :  { %637 = vadd.xlane.f32.xlu0 %v606_v16 }
 0x100   :  { %629 = vadd.xlane.f32.xlu2 %v602_v20 }
 0x101   :  { %621 = vadd.xlane.f32.xlu1 %v598_v21 }
 0x107   :  { %742 = vadd.xlane.f32.xlu0 %v715_v23 }
 0x108   :  { %740 = vadd.xlane.f32.xlu2 %v714_v25 }
 0x109   :  { %744 = vadd.xlane.f32.xlu1 %v716_v18 }
 0x10f   :  { %748 = vadd.xlane.f32.xlu0 %v718_v61  ;;  %v582_v61 = vld [vmem:[#allocation2 + $0x48] sm:$0xff] }
 0x110   :  { %746 = vadd.xlane.f32.xlu2 %v717_v31 }
 0x111   :  { %750 = vadd.xlane.f32.xlu1 %v719_v7 }
 0x133   :  { %v729_v18 = vpop.xlane.xlu2 %728  ;;  %v721_v27 = vpop.xlane.xlu1 %720 }
 0x134   :  { %v756_v22 = vadd.f32 %v729_v18, %v676_v57  ;;  %v752_v28 = vadd.f32 %v721_v27, %v672_v59  ;;  %v679_v57 = vld [vmem:[#allocation3 + $0x38] sm:$0xff] }
 0x136   :  { %772 = vst.msk [vmem:[#allocation3 + $0x20] sm:$0xff] %vm27_vm6, %v756_v22  ;;  %v586_v22 = vld [vmem:[#allocation2 + $0x68] sm:$0xff] }
 0x137   :  { %768 = vst.msk [vmem:[#allocation3] sm:$0xff] %vm27_vm6, %v752_v28 }
 0x13a   :  { %v737_v31 = vpop.xlane.xlu0 %736 }
 0x13b   :  { %v760_v33 = vadd.f32 %v737_v31, %v680_v29  ;;  %v723_v34 = vpop.xlane.xlu2 %722 }
 0x13c   :  { %v753_v35 = vadd.f32 %v723_v34, %v673_v30  ;;  %v608_v36 = vpop.xlane.xlu1 %607  ;;  %v833_v30 = vld [vmem:[%s1716_s2 + $0x8] sm:$0xff] }
 0x13d   :  { %776 = vst.msk [vmem:[#allocation3 + $0x40] sm:$0xff] %vm27_vm6, %v760_v33  ;;  %v639_v37 = vadd.f32 %v608_v36, %v573_v32  ;;  %v868_v7 = vld [vmem:[#allocation3 + $0x20] sm:$0xff] }
 0x13e   :  { %769 = vst.msk [vmem:[#allocation3 + $0x8] sm:$0xff] %vm27_vm6, %v753_v35  ;;  %v864_v4 = vld [vmem:[#allocation3] sm:$0xff] }
 0x13f   :  { %656 = vst.msk [vmem:[#allocation2] sm:$0xff] %vm27_vm6, %v639_v37 }
 0x142   :  { %v731_v40 = vpop.xlane.xlu0 %730 }
 0x143   :  { %v757_v42 = vadd.f32 %v731_v40, %v677_v38  ;;  %v624_v43 = vpop.xlane.xlu2 %623  ;;  %v575_v38 = vld [vmem:[#allocation2 + $0x10] sm:$0xff] }
 0x144   :  { %v647_v44 = vadd.f32 %v624_v43, %v581_v39  ;;  %v616_v45 = vpop.xlane.xlu1 %615  ;;  %v872_v25 = vld [vmem:[#allocation3 + $0x40] sm:$0xff]  ;;  %v587_v40 = vld [vmem:[#allocation2 + $0x70] sm:$0xff] }
 0x145   :  { %773 = vst.msk [vmem:[#allocation3 + $0x28] sm:$0xff] %vm27_vm6, %v757_v42  ;;  %v643_v46 = vadd.f32 %v616_v45, %v577_v41  ;;  %v865_v37 = vld [vmem:[#allocation3 + $0x8] sm:$0xff]  ;;  %v675_v42 = vld [vmem:[#allocation3 + $0x18] sm:$0xff] }
 0x146   :  { %v784_v47 = vld [vmem:[#allocation2] sm:$0xff]  ;;  %664 = vst.msk [vmem:[#allocation2 + $0x40] sm:$0xff] %vm27_vm6, %v647_v44 }
 0x147   :  { %1055 = vlog2.f32 %v784_v47  ;;  %660 = vst.msk [vmem:[#allocation2 + $0x20] sm:$0xff] %vm27_vm6, %v643_v46  ;;  %v837_v46 = vld [vmem:[%s1716_s2 + $0x28] sm:$0xff] }
 0x14a   :  { %v632_v50 = vpop.xlane.xlu0 %631 }
 0x14b   :  { %v651_v53 = vadd.f32 %v632_v50, %v585_v48  ;;  %v610_v54 = vpop.xlane.xlu2 %609 }
 0x14c   :  { %v640_v55 = vadd.f32 %v610_v54, %v574_v49  ;;  %v739_v58 = vpop.xlane.xlu1 %738  ;;  %v869_v54 = vld [vmem:[#allocation3 + $0x28] sm:$0xff] }
 0x14d   :  { %v1056_v60 = vpop.eup %1055  ;;  %v792_v56 = vld [vmem:[#allocation2 + $0x40] sm:$0xff]  ;;  %668 = vst.msk [vmem:[#allocation2 + $0x60] sm:$0xff] %vm27_vm6, %v651_v53  ;;  %v761_v63 = vadd.f32 %v739_v58, %v681_v51 }
 0x14e   :  { %v801_v0 = vmul.f32 0.6931472, %v1056_v60  ;;  %1057 = vlog2.f32 %v792_v56  ;;  %v788_v1 = vld [vmem:[#allocation2 + $0x20] sm:$0xff]  ;;  %657 = vst.msk [vmem:[#allocation2 + $0x8] sm:$0xff] %vm27_vm6, %v640_v55  ;;  %v579_v55 = vld [vmem:[#allocation2 + $0x30] sm:$0xff]  ;;  %v576_v60 = vld [vmem:[#allocation2 + $0x18] sm:$0xff] }
 0x14f   :  { %1059 = vlog2.f32 %v788_v1  ;;  %777 = vst.msk [vmem:[#allocation3 + $0x48] sm:$0xff] %vm27_vm6, %v761_v63  ;;  %v583_v56 = vld [vmem:[#allocation2 + $0x50] sm:$0xff] }
 0x150   :  { %v848_v2 = vmul.f32 %v832_v62, %v801_v0  ;;  %v841_v0 = vld [vmem:[%s1716_s2 + $0x48] sm:$0xff] }
 0x152   :  { %v880_v5 = vsub.f32 %v848_v2, %v864_v4  ;;  %v725_v6 = vpop.xlane.xlu0 %724 }
 0x153   :  { %v754_v9 = vadd.f32 %v725_v6, %v674_v3  ;;  %v618_v10 = vpop.xlane.xlu2 %617 }
 0x154   :  { %v1058_v11 = vpop.eup %1057  ;;  %896 = vst.msk [vmem:[%s1720_s6] sm:$0xff] %vm27_vm6, %v880_v5  ;;  %v644_v13 = vadd.f32 %v618_v10, %v578_v52  ;;  %v733_v14 = vpop.xlane.xlu1 %732 }
 0x155   :  { %v1060_v16 = vpop.eup %1059  ;;  %v817_v17 = vmul.f32 0.6931472, %v1058_v11  ;;  %v785_v20 = vld [vmem:[#allocation2 + $0x8] sm:$0xff]  ;;  %770 = vst.msk [vmem:[#allocation3 + $0x10] sm:$0xff] %vm27_vm6, %v754_v9  ;;  %v758_v21 = vadd.f32 %v733_v14, %v678_v8  ;;  %v588_v11 = vld [vmem:[#allocation2 + $0x78] sm:$0xff] }
 0x156   :  { %v809_v23 = vmul.f32 0.6931472, %v1060_v16  ;;  %1061 = vlog2.f32 %v785_v20  ;;  %661 = vst.msk [vmem:[#allocation2 + $0x28] sm:$0xff] %vm27_vm6, %v644_v13  ;;  %v873_v9 = vld [vmem:[#allocation3 + $0x48] sm:$0xff]  ;;  %v580_v14 = vld [vmem:[#allocation2 + $0x38] sm:$0xff] }
 0x157   :  { %v856_v24 = vmul.f32 %v840_v12, %v817_v17  ;;  %774 = vst.msk [vmem:[#allocation3 + $0x30] sm:$0xff] %vm27_vm6, %v758_v21  ;;  %v584_v12 = vld [vmem:[#allocation2 + $0x58] sm:$0xff]  ;;  %v834_v17 = vld [vmem:[%s1716_s2 + $0x10] sm:$0xff] }
 0x158   :  { %v852_v26 = vmul.f32 %v836_v19, %v809_v23 }
 0x159   :  { %v888_v15 = vsub.f32 %v856_v24, %v872_v25 }
 0x15a   :  { %v884_v59 = vsub.f32 %v852_v26, %v868_v7  ;;  %v626_v18 = vpop.xlane.xlu0 %625  ;;  %v796_v26 = vld [vmem:[#allocation2 + $0x60] sm:$0xff] }
 0x15b   :  { %904 = vst.msk [vmem:[%s1720_s6 + $0x40] sm:$0xff] %vm27_vm6, %v888_v15  ;;  %v648_v27 = vadd.f32 %v626_v18, %v582_v61  ;;  %v735_v28 = vpop.xlane.xlu2 %734 }
 0x15c   :  { %v1062_v29 = vpop.eup %1061  ;;  %900 = vst.msk [vmem:[%s1720_s6 + $0x20] sm:$0xff] %vm27_vm6, %v884_v59  ;;  %v759_v31 = vadd.f32 %v735_v28, %v679_v57  ;;  %v634_v32 = vpop.xlane.xlu1 %633  ;;  %v866_v59 = vld [vmem:[#allocation3 + $0x10] sm:$0xff] }
 0x15d   :  { %v803_v33 = vmul.f32 0.6931472, %v1062_v29  ;;  %v789_v34 = vld [vmem:[#allocation2 + $0x28] sm:$0xff]  ;;  %665 = vst.msk [vmem:[#allocation2 + $0x48] sm:$0xff] %vm27_vm6, %v648_v27  ;;  %v652_v35 = vadd.f32 %v634_v32, %v586_v22  ;;  %v683_v22 = vld [vmem:[#allocation3 + $0x58] sm:$0xff]  ;;  %v682_v28 = vld [vmem:[#allocation3 + $0x50] sm:$0xff] }
 0x15e   :  { %1063 = vlog2.f32 %v789_v34  ;;  %775 = vst.msk [vmem:[#allocation3 + $0x38] sm:$0xff] %vm27_vm6, %v759_v31  ;;  %v684_v31 = vld [vmem:[#allocation3 + $0x60] sm:$0xff] }
 0x15f   :  { %v849_v36 = vmul.f32 %v833_v30, %v803_v33  ;;  %669 = vst.msk [vmem:[#allocation2 + $0x68] sm:$0xff] %vm27_vm6, %v652_v35  ;;  %v838_v33 = vld [vmem:[%s1716_s2 + $0x30] sm:$0xff] }
 0x161   :  { %v881_v39 = vsub.f32 %v849_v36, %v865_v37 }
 0x162   :  { %v612_v41 = vpop.xlane.xlu0 %611 }
 0x163   :  { %897 = vst.msk [vmem:[%s1720_s6 + $0x8] sm:$0xff] %vm27_vm6, %v881_v39  ;;  %v641_v43 = vadd.f32 %v612_v41, %v575_v38  ;;  %v636_v44 = vpop.xlane.xlu2 %635  ;;  %v835_v38 = vld [vmem:[%s1716_s2 + $0x18] sm:$0xff] }
 0x164   :  { %v1064_v45 = vpop.eup %1063  ;;  %v793_v47 = vld [vmem:[#allocation2 + $0x48] sm:$0xff]  ;;  %v653_v48 = vadd.f32 %v636_v44, %v587_v40  ;;  %v727_v49 = vpop.xlane.xlu1 %726 }
 0x165   :  { %v811_v50 = vmul.f32 0.6931472, %v1064_v45  ;;  %1065 = vlog2.f32 %v793_v47  ;;  %658 = vst.msk [vmem:[#allocation2 + $0x10] sm:$0xff] %vm27_vm6, %v641_v43  ;;  %v755_v51 = vadd.f32 %v727_v49, %v675_v42  ;;  %v870_v49 = vld [vmem:[#allocation3 + $0x30] sm:$0xff] }
 0x166   :  { %670 = vst.msk [vmem:[#allocation2 + $0x70] sm:$0xff] %vm27_vm6, %v653_v48  ;;  %v797_v27 = vld [vmem:[#allocation2 + $0x68] sm:$0xff] }
 0x167   :  { %v853_v53 = vmul.f32 %v837_v46, %v811_v50  ;;  %771 = vst.msk [vmem:[#allocation3 + $0x18] sm:$0xff] %vm27_vm6, %v755_v51 }
 0x169   :  { %v885_v58 = vsub.f32 %v853_v53, %v869_v54 }
 0x16a   :  { %v620_v62 = vpop.xlane.xlu0 %619 }
 0x16b   :  { %v1066_v63 = vpop.eup %1065  ;;  %901 = vst.msk [vmem:[%s1720_s6 + $0x28] sm:$0xff] %vm27_vm6, %v885_v58  ;;  %v645_v1 = vadd.f32 %v620_v62, %v579_v55  ;;  %v614_v2 = vpop.xlane.xlu2 %613  ;;  %v686_v55 = vld [vmem:[#allocation3 + $0x70] sm:$0xff] }
 0x16c   :  { %v819_v3 = vmul.f32 0.6931472, %v1066_v63  ;;  %v786_v4 = vld [vmem:[#allocation2 + $0x10] sm:$0xff]  ;;  %v642_v52 = vadd.f32 %v614_v2, %v576_v60  ;;  %v628_v5 = vpop.xlane.xlu1 %627  ;;  %v687_v2 = vld [vmem:[#allocation3 + $0x78] sm:$0xff] }
 0x16d   :  { %1067 = vlog2.f32 %v786_v4  ;;  %662 = vst.msk [vmem:[#allocation2 + $0x30] sm:$0xff] %vm27_vm6, %v645_v1  ;;  %v649_v6 = vadd.f32 %v628_v5, %v583_v56  ;;  %v798_v29 = vld [vmem:[#allocation2 + $0x70] sm:$0xff]  ;;  %v685_v56 = vld [vmem:[#allocation3 + $0x68] sm:$0xff] }
 0x16e   :  { %v857_v8 = vmul.f32 %v841_v0, %v819_v3  ;;  %659 = vst.msk [vmem:[#allocation2 + $0x18] sm:$0xff] %vm27_vm6, %v642_v52  ;;  %v867_v51 = vld [vmem:[#allocation3 + $0x18] sm:$0xff]  ;;  %v842_v62 = vld [vmem:[%s1716_s2 + $0x50] sm:$0xff]  ;;  %v844_v0 = vld [vmem:[%s1716_s2 + $0x60] sm:$0xff] }
 0x16f   :  { %666 = vst.msk [vmem:[#allocation2 + $0x50] sm:$0xff] %vm27_vm6, %v649_v6  ;;  %v843_v6 = vld [vmem:[%s1716_s2 + $0x58] sm:$0xff] }
 0x170   :  { %v889_v10 = vsub.f32 %v857_v8, %v873_v9 }
 0x172   :  { %905 = vst.msk [vmem:[%s1720_s6 + $0x48] sm:$0xff] %vm27_vm6, %v889_v10  ;;  %v638_v13 = vpop.xlane.xlu0 %637 }
 0x173   :  { %v1068_v16 = vpop.eup %1067  ;;  %v654_v19 = vadd.f32 %v638_v13, %v588_v11  ;;  %v630_v20 = vpop.xlane.xlu2 %629  ;;  %v839_v13 = vld [vmem:[%s1716_s2 + $0x38] sm:$0xff] }
 0x174   :  { %v805_v21 = vmul.f32 0.6931472, %v1068_v16  ;;  %v790_v23 = vld [vmem:[#allocation2 + $0x30] sm:$0xff]  ;;  %v650_v24 = vadd.f32 %v630_v20, %v584_v12  ;;  %v622_v25 = vpop.xlane.xlu1 %621 }
 0x175   :  { %1069 = vlog2.f32 %v790_v23  ;;  %v787_v61 = vld [vmem:[#allocation2 + $0x18] sm:$0xff]  ;;  %671 = vst.msk [vmem:[#allocation2 + $0x78] sm:$0xff] %vm27_vm6, %v654_v19  ;;  %v646_v7 = vadd.f32 %v622_v25, %v580_v14 }
 0x176   :  { %v850_v15 = vmul.f32 %v834_v17, %v805_v21  ;;  %1071 = vlog2.f32 %v787_v61  ;;  %v794_v57 = vld [vmem:[#allocation2 + $0x50] sm:$0xff]  ;;  %667 = vst.msk [vmem:[#allocation2 + $0x58] sm:$0xff] %vm27_vm6, %v650_v24 }
 0x177   :  { %1073 = vlog2.f32 %v794_v57  ;;  %663 = vst.msk [vmem:[#allocation2 + $0x38] sm:$0xff] %vm27_vm6, %v646_v7  ;;  %v846_v57 = vld [vmem:[%s1716_s2 + $0x70] sm:$0xff] }
 0x178   :  { %1075 = vlog2.f32 %v796_v26  ;;  %v882_v18 = vsub.f32 %v850_v15, %v866_v59  ;;  %v871_v59 = vld [vmem:[#allocation3 + $0x38] sm:$0xff] }
 0x179   :  { %1077 = vlog2.f32 %v797_v27  ;;  %v845_v27 = vld [vmem:[%s1716_s2 + $0x68] sm:$0xff] }
 0x17a   :  { %898 = vst.msk [vmem:[%s1720_s6 + $0x10] sm:$0xff] %vm27_vm6, %v882_v18  ;;  %v743_v30 = vpop.xlane.xlu0 %742  ;;  %1079 = vlog2.f32 %v798_v29  ;;  %v847_v29 = vld [vmem:[%s1716_s2 + $0x78] sm:$0xff] }
 0x17b   :  { %v1070_v32 = vpop.eup %1069  ;;  %v763_v34 = vadd.f32 %v743_v30, %v683_v22  ;;  %v741_v35 = vpop.xlane.xlu2 %740 }
 0x17c   :  { %v1072_v36 = vpop.eup %1071  ;;  %v813_v37 = vmul.f32 0.6931472, %v1070_v32  ;;  %v762_v39 = vadd.f32 %v741_v35, %v682_v28  ;;  %v745_v40 = vpop.xlane.xlu1 %744  ;;  %v799_v43 = vld [vmem:[#allocation2 + $0x78] sm:$0xff] }
 0x17d   :  { %v1074_v41 = vpop.eup %1073  ;;  %v807_v42 = vmul.f32 0.6931472, %v1072_v36  ;;  %v795_v44 = vld [vmem:[#allocation2 + $0x58] sm:$0xff]  ;;  %779 = vst.msk [vmem:[#allocation3 + $0x58] sm:$0xff] %vm27_vm6, %v763_v34  ;;  %v764_v45 = vadd.f32 %v745_v40, %v684_v31 }
 0x17e   :  { %v1076_v46 = vpop.eup %1075  ;;  %v854_v47 = vmul.f32 %v838_v33, %v813_v37  ;;  %1081 = vlog2.f32 %v795_v44  ;;  %v791_v48 = vld [vmem:[#allocation2 + $0x38] sm:$0xff]  ;;  %778 = vst.msk [vmem:[#allocation3 + $0x50] sm:$0xff] %vm27_vm6, %v762_v39  ;;  %v821_v54 = vmul.f32 0.6931472, %v1074_v41 }
 0x17f   :  { %v851_v50 = vmul.f32 %v835_v38, %v807_v42  ;;  %1083 = vlog2.f32 %v791_v48  ;;  %780 = vst.msk [vmem:[#allocation3 + $0x60] sm:$0xff] %vm27_vm6, %v764_v45  ;;  %v825_v58 = vmul.f32 0.6931472, %v1076_v46  ;;  %v1078_v63 = vpop.eup %1077 }
 0x180   :  { %v886_v53 = vsub.f32 %v854_v47, %v870_v49  ;;  %1085 = vlog2.f32 %v799_v43  ;;  %v1080_v3 = vpop.eup %1079  ;;  %v858_v8 = vmul.f32 %v842_v62, %v821_v54  ;;  %v827_v61 = vmul.f32 0.6931472, %v1078_v63 }
 0x181   :  { %v883_v60 = vsub.f32 %v851_v50, %v867_v51  ;;  %v860_v16 = vmul.f32 %v844_v0, %v825_v58  ;;  %v829_v24 = vmul.f32 0.6931472, %v1080_v3 }
 0x182   :  { %902 = vst.msk [vmem:[%s1720_s6 + $0x30] sm:$0xff] %vm27_vm6, %v886_v53  ;;  %v749_v1 = vpop.xlane.xlu0 %748  ;;  %v861_v32 = vmul.f32 %v845_v27, %v827_v61 }
 0x183   :  { %899 = vst.msk [vmem:[%s1720_s6 + $0x18] sm:$0xff] %vm27_vm6, %v883_v60  ;;  %v766_v4 = vadd.f32 %v749_v1, %v686_v55  ;;  %v747_v52 = vpop.xlane.xlu2 %746  ;;  %v862_v30 = vmul.f32 %v846_v57, %v829_v24 }
 0x184   :  { %v1082_v5 = vpop.eup %1081  ;;  %v765_v9 = vadd.f32 %v747_v52, %v685_v56  ;;  %v751_v10 = vpop.xlane.xlu1 %750  ;;  %v875_v15 = vld [vmem:[#allocation3 + $0x58] sm:$0xff] }
 0x185   :  { %v1084_v11 = vpop.eup %1083  ;;  %v823_v12 = vmul.f32 0.6931472, %v1082_v5  ;;  %v874_v14 = vld [vmem:[#allocation3 + $0x50] sm:$0xff]  ;;  %782 = vst.msk [vmem:[#allocation3 + $0x70] sm:$0xff] %vm27_vm6, %v766_v4  ;;  %v767_v17 = vadd.f32 %v751_v10, %v687_v2 }
 0x186   :  { %v1086_v19 = vpop.eup %1085  ;;  %v815_v20 = vmul.f32 0.6931472, %v1084_v11  ;;  %v890_v21 = vsub.f32 %v858_v8, %v874_v14  ;;  %v876_v23 = vld [vmem:[#allocation3 + $0x60] sm:$0xff]  ;;  %781 = vst.msk [vmem:[#allocation3 + $0x68] sm:$0xff] %vm27_vm6, %v765_v9 }
 0x187   :  { %v859_v25 = vmul.f32 %v843_v6, %v823_v12  ;;  %v892_v26 = vsub.f32 %v860_v16, %v876_v23  ;;  %783 = vst.msk [vmem:[#allocation3 + $0x78] sm:$0xff] %vm27_vm6, %v767_v17  ;;  %v831_v18 = vmul.f32 0.6931472, %v1086_v19 }
 0x188   :  { %v855_v7 = vmul.f32 %v839_v13, %v815_v20  ;;  %906 = vst.msk [vmem:[%s1720_s6 + $0x50] sm:$0xff] %vm27_vm6, %v890_v21 }
 0x189   :  { %v891_v22 = vsub.f32 %v859_v25, %v875_v15  ;;  %908 = vst.msk [vmem:[%s1720_s6 + $0x60] sm:$0xff] %vm27_vm6, %v892_v26  ;;  %v863_v35 = vmul.f32 %v847_v29, %v831_v18 }
 0x18a   :  { %v887_v28 = vsub.f32 %v855_v7, %v871_v59 }
 0x18b   :  { %907 = vst.msk [vmem:[%s1720_s6 + $0x58] sm:$0xff] %vm27_vm6, %v891_v22 }
 0x18c   :  { %903 = vst.msk [vmem:[%s1720_s6 + $0x38] sm:$0xff] %vm27_vm6, %v887_v28  ;;  %v878_v31 = vld [vmem:[#allocation3 + $0x70] sm:$0xff] }
 0x18d   :  { %v894_v33 = vsub.f32 %v862_v30, %v878_v31  ;;  %v877_v34 = vld [vmem:[#allocation3 + $0x68] sm:$0xff] }
 0x18e   :  { %v893_v36 = vsub.f32 %v861_v32, %v877_v34  ;;  %v879_v37 = vld [vmem:[#allocation3 + $0x78] sm:$0xff] }
 0x18f   :  { %910 = vst.msk [vmem:[%s1720_s6 + $0x70] sm:$0xff] %vm27_vm6, %v894_v33  ;;  %v895_v38 = vsub.f32 %v863_v35, %v879_v37 }
 0x190   :  { %909 = vst.msk [vmem:[%s1720_s6 + $0x68] sm:$0xff] %vm27_vm6, %v893_v36 }
 0x191   :  { %911 = vst.msk [vmem:[%s1720_s6 + $0x78] sm:$0xff] %vm27_vm6, %v895_v38 }
 0x192   :  { %1111 = dma.done.wait [#allocation5], 2048  }
 0x193   :  { %1112 = vsyncadd [#allocation5], 4294965248 }
 0x194   :  { %933 = vsyncpa [#allocation5], 1 }

</bundles_post_ra>
